<compile_context>
chip_gen: v5e
topology: v5e:2x2
jax: 0.10.0
libtpu: 0.0.40
codegen_flags: <defaults>
</compile_context>

<pallas_src>
import functools

import numpy as np
import jax
import jax.numpy as jnp
from jax.experimental import pallas as pl
from jax.experimental.pallas import tpu as pltpu

NUM_QUBITS = 4
N_STATES = 2 ** NUM_QUBITS          # 16 basis states
HALF = NUM_QUBITS // 2              # 2 expectation outputs
PACK = 128 // N_STATES              # 8 batch rows packed per 128-lane row
PACKED_IN = PACK * N_STATES         # 128
PACKED_OUT = PACK * HALF            # 16


def build_decode_indices(num_qubits: int):
    """Reproduce Decode_Layer.__init__ index construction (num_qubits must be 4)."""
    assert num_qubits == 4, "Decode_Layer only supports num_qubits == 4"
    n_states = 2 ** num_qubits
    mask = 2 ** np.arange(num_qubits - 1, -1, -1)
    bits = ((np.arange(n_states)[:, None] & mask) != 0).astype(np.float32)
    half = num_qubits // 2
    high_index, low_index = [], []
    for i in range(half):
        ind = i * 2
        h = [j for j in range(n_states)
             if (bits[j, ind] == 1 and bits[j, ind + 1] == 1)
             or (bits[j, ind] == 0 and bits[j, ind + 1] == 0)]
        # module quirk: low-index universe is arange(num_qubits ** 2) (== 16 here)
        l = sorted(set(range(num_qubits ** 2)) - set(h))
        high_index.append(h)
        low_index.append(l)
    return np.asarray(high_index), np.asarray(low_index)


@functools.lru_cache(maxsize=None)
def _block_sign_np() -> np.ndarray:
    """Host-built block-diagonal [128, 16] sign matrix (built exactly once).

    Block j (input lanes 16j..16j+15, output cols 2j..2j+1) holds the module's
    16x2 +/-1 decode matrix (from high_index / low_index); off-diagonal is 0.
    """
    high_index, low_index = build_decode_indices(NUM_QUBITS)
    sign16 = np.zeros((N_STATES, HALF), dtype=np.float32)
    for i in range(HALF):
        sign16[high_index[i], i] = 1.0
        sign16[low_index[i], i] = -1.0
    blk = np.zeros((PACKED_IN, PACKED_OUT), dtype=np.float32)
    for j in range(PACK):
        blk[j * N_STATES:(j + 1) * N_STATES, j * HALF:(j + 1) * HALF] = sign16
    return blk


def _decode_kernel(x_ref, s_ref, o_ref):
    # [tb, 128] @ [128, 16] on the MXU, f32 accumulation.
    o_ref[...] = jnp.dot(x_ref[...], s_ref[...],
                         preferred_element_type=jnp.float32)


@functools.partial(jax.jit, static_argnames=("block_rows",))
def decode_layer(x: jax.Array, *, block_rows: int = 4096) -> jax.Array:
    """out[b, i] = sum(x[b, high_idx[i]]) - sum(x[b, low_idx[i]]); x: [B, 16]."""
    B, D = x.shape
    assert D == N_STATES, f"expected {N_STATES} basis-state columns, got {D}"

    # Keep bf16 / f32 inputs on the wire as-is; anything else -> f32.
    if x.dtype not in (jnp.float32, jnp.bfloat16):
        x = x.astype(jnp.float32)
    in_dtype = x.dtype
    in_bytes = np.dtype(in_dtype).itemsize

    # Single conditional pad: batch -> multiple of PACK (skipped when aligned).
    rows = pl.cdiv(B, PACK)
    Bp = rows * PACK
    if Bp != B:
        x = jnp.pad(x, ((0, Bp - B), (0, 0)))
    xp = x.reshape(rows, PACKED_IN)              # free contiguous reshape

    sign = jnp.asarray(_block_sign_np(), dtype=in_dtype)   # tiny constant

    # Tile selection. Sublane alignment: 16 rows for bf16, 8 for f32.
    row_align = 16 if in_dtype == jnp.bfloat16 else 8
    # Cap so 2x input + 2x output buffers stay well under v5e's 16 MiB
    # scoped-VMEM default (also fine on v6e/v7x defaults).
    per_row_bytes = 2 * (PACKED_IN * in_bytes + PACKED_OUT * 4)
    tb_cap = max(row_align,
                 (12 * 1024 * 1024 // per_row_bytes) // row_align * row_align)
    if rows <= 2 * row_align:
        tb = rows                                # tiny: single full-extent block
    else:
        # Aim for >= 2 grid steps so the "parallel" axis shards across both
        # v7x TensorCores, capped by block_rows and the VMEM budget.
        target = min(block_rows, tb_cap, -(-rows // 2))
        tb = ((target + row_align - 1) // row_align) * row_align
    grid = (pl.cdiv(rows, tb),)                  # partial last block is fine

    out = pl.pallas_call(
        _decode_kernel,
        out_shape=jax.ShapeDtypeStruct((rows, PACKED_OUT), jnp.float32),
        grid=grid,
        in_specs=[
            pl.BlockSpec((tb, PACKED_IN), lambda i: (i, 0)),
            # constant block index -> DMA'd once, stays VMEM-resident
            pl.BlockSpec((PACKED_IN, PACKED_OUT), lambda i: (0, 0)),
        ],
        out_specs=pl.BlockSpec((tb, PACKED_OUT), lambda i: (i, 0)),
        compiler_params=pltpu.CompilerParams(
            dimension_semantics=("parallel",),
        ),
        cost_estimate=pl.CostEstimate(
            flops=2 * rows * PACKED_IN * PACKED_OUT,
            transcendentals=0,
            bytes_accessed=rows * (PACKED_IN * in_bytes + PACKED_OUT * 4)
            + PACKED_IN * PACKED_OUT * in_bytes,
        ),
    )(xp, sign)

    # [rows, 16] -> [rows*8, 2] (contiguous), drop padded batch rows.
    return out.reshape(Bp, HALF)[:B]


def decode_reference(x: jax.Array, num_qubits: int = NUM_QUBITS) -> jax.Array:
    """Pure-JAX mirror of the PyTorch gather/sum forward (for verification)."""
    high_index, low_index = build_decode_indices(num_qubits)
    half = num_qubits // 2
    x = x.astype(jnp.float32)
    outs = []
    for i in range(half):
        high_x = jnp.take(x, jnp.asarray(high_index[i]), axis=1)
        low_x = jnp.take(x, jnp.asarray(low_index[i]), axis=1)
        outs.append(jnp.sum(high_x, axis=1) - jnp.sum(low_x, axis=1))
    return jnp.stack(outs, axis=0).T  # (batch, num_qubits // 2)


if __name__ == "__main__":
    k0, k1, k2 = jax.random.split(jax.random.PRNGKey(0), 3)

    # Test 1: tiny f32 batch (pack-padding + single full-extent block path).
    b1 = 4
    x1 = jax.random.uniform(k0, (b1, N_STATES), dtype=jnp.float32)
    out1 = jax.block_until_ready(decode_layer(x1))
    assert out1.shape == (b1, HALF) and out1.dtype == jnp.float32
    np.testing.assert_allclose(np.asarray(out1), np.asarray(decode_reference(x1)),
                               rtol=1e-5, atol=1e-5)

    # Test 2: f32 batch with no padding needed; default block_rows still yields
    # a 2-step parallel grid with a partial last block (correctness check only).
    b2 = 1000
    x2 = jax.random.uniform(k1, (b2, N_STATES), dtype=jnp.float32)
    out2 = jax.block_until_ready(decode_layer(x2))
    np.testing.assert_allclose(np.asarray(out2), np.asarray(decode_reference(x2)),
                               rtol=1e-5, atol=1e-5)

    # Test 3: bf16 inputs stay bf16 on the wire (f32 MXU accumulation); small
    # block_rows only to exercise the multi-block grid + bf16 tile alignment.
    b3 = 300
    x3 = jax.random.uniform(k2, (b3, N_STATES),
                            dtype=jnp.float32).astype(jnp.bfloat16)
    out3 = jax.block_until_ready(decode_layer(x3, block_rows=64))
    ref3 = decode_reference(x3.astype(jnp.float32))
    assert out3.shape == (b3, HALF) and out3.dtype == jnp.float32
    np.testing.assert_allclose(np.asarray(out3), np.asarray(ref3),
                               rtol=1e-3, atol=1e-3)

    print("KERNEL_OK")
</pallas_src>

<mosaic_0001>
module attributes {stable_mosaic.version = 11 : i64} {
  func.func @_decode_kernel(%arg0: i32, %arg1: memref<1x128xf32, #tpu.memory_space<vmem>>, %arg2: memref<128x16xf32, #tpu.memory_space<vmem>>, %arg3: memref<1x16xf32, #tpu.memory_space<vmem>>) attributes {dimension_semantics = [#tpu.dimension_semantics<parallel>], iteration_bounds = array<i64: 1>, scalar_prefetch = 0 : i64, scratch_operands = 0 : i64, tpu.core_type = #tpu.core_type<tc>, window_params = [{transform_indices = @transform_0, window_bounds = array<i64: 1, 128>}, {pipeline_mode = #tpu.pipeline_mode<synchronous>, transform_indices = @transform_1, window_bounds = array<i64: 128, 16>}, {transform_indices = @transform_2, window_bounds = array<i64: 1, 16>}]} {
    %c0 = arith.constant 0 : index
    %c0_0 = arith.constant 0 : index
    %0 = vector.load %arg1[%c0, %c0_0] : memref<1x128xf32, #tpu.memory_space<vmem>>, vector<1x128xf32>
    %c0_1 = arith.constant 0 : index
    %c0_2 = arith.constant 0 : index
    %1 = vector.load %arg2[%c0_1, %c0_2] : memref<128x16xf32, #tpu.memory_space<vmem>>, vector<128x16xf32>
    %cst = arith.constant dense<0.000000e+00> : vector<1x16xf32>
    %2 = tpu.matmul %0, %1, %cst {dimension_numbers = #tpu.dot_dimension_numbers<[1], [0], [0], [1], [0, 0, 1, 1], [], []>} : vector<1x128xf32>, vector<128x16xf32>, vector<1x16xf32> -> vector<1x16xf32>
    %c0_3 = arith.constant 0 : index
    %c0_4 = arith.constant 0 : index
    %3 = vector.load %arg3[%c0_3, %c0_4] : memref<1x16xf32, #tpu.memory_space<vmem>>, vector<1x16xf32>
    tpu.vector_store %arg3[%c0_3, %c0_4], %2 {strides = array<i32>} : memref<1x16xf32, #tpu.memory_space<vmem>>, vector<1x16xf32>,
    return
  }
  func.func @transform_0(%arg0: i32) -> (i32, i32) {
    %c0_i32 = arith.constant 0 : i32
    %c0_i32_0 = arith.constant 0 : i32
    return %arg0, %c0_i32 : i32, i32
  }
  func.func @transform_1(%arg0: i32) -> (i32, i32) {
    %c0_i32 = arith.constant 0 : i32
    %c0_i32_0 = arith.constant 0 : i32
    %c0_i32_1 = arith.constant 0 : i32
    return %c0_i32, %c0_i32_0 : i32, i32
  }
  func.func @transform_2(%arg0: i32) -> (i32, i32) {
    %c0_i32 = arith.constant 0 : i32
    %c0_i32_0 = arith.constant 0 : i32
    return %arg0, %c0_i32 : i32, i32
  }
}

</mosaic_0001>

<bundles_post_ra>
// kernel: decode_layer.1
= control target key start
LH: loop header
LB: loop body
LE: loop exit
PB: predicated region body
PF: predicated region fallthrough
CT: control target
= control target key end

     0   :  { %7 = vsyncpa [#allocation3], 0  ;;  %s100_s12 = smov [#allocation2]   ;;  %s101_s14 = smov 128   ;;  %s127_s0 = inlined_call_operand.vmem [shape: f32[1,128], index: 0, kind: input, shape index: {}]   ;;  %s128_s1 = inlined_call_operand.hbm [shape: f32[128,16], index: 1, kind: input, shape index: {}]   ;;  %s129_s2 = inlined_call_operand.vmem [shape: f32[1,16], index: 2, kind: output, shape index: {}]  }
   0x1   :  { %s14_s11 = sshll.u32 %s128_s1, 4  ;;  %s16_s13 = sshll.u32 %s100_s12, 4  ;;  %s15_s11 = int_to_ptr.hbm [resolvable:$true] %s14_s11  ;;  %s17_s13 = int_to_ptr.vmem [resolvable:$true] %s16_s13 }
   0x2   :  { %s102_s15 = smov 8  }
   0x3   :  { %22 = dma.hbm_to_vmem [thread:$0]  %s15_s11, 2048, %s17_s13, [#allocation3], %s101_s14, %s101_s14, %s102_s15  }
   0x4   :  { %98 = dma.done.wait [#allocation3], 2048  }
   0x5   :  { %99 = vsyncadd [#allocation3], 4294965248  ;;  %v43_v0 = vld [vmem:[#allocation2 + $0x78] sm:$0xff]  ;;  %v42_v1 = vld [vmem:[#allocation2 + $0x70] sm:$0xff]  ;;  %vm64_vm0 = vcmask 122880  }
   0x6   :  { %44 = vmatpush.msra.mxu0 %v43_v0  ;;  %v41_v2 = vld [vmem:[#allocation2 + $0x68] sm:$0xff]  ;;  %v40_v3 = vld [vmem:[#allocation2 + $0x60] sm:$0xff]  ;;  %v39_v4 = vld [vmem:[#allocation2 + $0x58] sm:$0xff] }
   0x7   :  { %v38_v5 = vld [vmem:[#allocation2 + $0x50] sm:$0xff]  ;;  %v37_v6 = vld [vmem:[#allocation2 + $0x48] sm:$0xff]  ;;  %v36_v7 = vld [vmem:[#allocation2 + $0x40] sm:$0xff] }
   0x8   :  { %45 = vmatpush.msra.mxu0 %v42_v1  ;;  %v35_v8 = vld [vmem:[#allocation2 + $0x38] sm:$0xff]  ;;  %v34_v9 = vld [vmem:[#allocation2 + $0x30] sm:$0xff]  ;;  %v33_v10 = vld [vmem:[#allocation2 + $0x28] sm:$0xff] }
   0x9   :  { %v32_v11 = vld [vmem:[#allocation2 + $0x20] sm:$0xff]  ;;  %v31_v12 = vld [vmem:[#allocation2 + $0x18] sm:$0xff]  ;;  %v30_v13 = vld [vmem:[#allocation2 + $0x10] sm:$0xff] }
   0xa   :  { %46 = vmatpush.msra.mxu0 %v41_v2  ;;  %v29_v14 = vld [vmem:[#allocation2 + $0x8] sm:$0xff]  ;;  %v28_v15 = vld [vmem:[#allocation2] sm:$0xff] }
   0xb   :  { %v27_v16 = vld [vmem:[%s127_s0] sm:$0x1] }
   0xc   :  { %47 = vmatpush.msra.mxu0 %v40_v3 }
   0xe   :  { %48 = vmatpush.msra.mxu0 %v39_v4 }
  0x10   :  { %49 = vmatpush.msra.mxu0 %v38_v5 }
  0x12   :  { %50 = vmatpush.msra.mxu0 %v37_v6 }
  0x14   :  { %51 = vmatpush.msra.mxu0 %v36_v7 }
  0x16   :  { %52 = vmatpush.msra.mxu0 %v35_v8 }
  0x18   :  { %53 = vmatpush.msra.mxu0 %v34_v9 }
  0x1a   :  { %54 = vmatpush.msra.mxu0 %v33_v10 }
  0x1c   :  { %55 = vmatpush.msra.mxu0 %v32_v11 }
  0x1e   :  { %56 = vmatpush.msra.mxu0 %v31_v12 }
  0x20   :  { %57 = vmatpush.msra.mxu0 %v30_v13 }
  0x22   :  { %58 = vmatpush.msra.mxu0 %v29_v14 }
  0x24   :  { %59 = vmatpush.msra.mxu0 %v28_v15 }
  0x25   :  { %60 = vmatmul.f32.vlgmr.msra.gmra.mxu0 %v27_v16 }
  0xa2   :  { %v61_v17 = vpop.f32.mrf.mxu0 }
  0xa3   :  { %65 = vst.msk [vmem:[%s129_s2] sm:$0x1] %vm64_vm0, %v61_v17 }
  0xa4   :  { %70 = vsyncpa [#allocation3], 1 }

</bundles_post_ra>
